<compile_context>
chip_gen: v5e
topology: v5e:2x2
jax: 0.10.0
libtpu: 0.0.40
codegen_flags: <defaults>
</compile_context>

<pallas_src>
import functools

import jax
import jax.numpy as jnp
from jax import lax
from jax.experimental import pallas as pl
from jax.experimental.pallas import tpu as pltpu

_LANE = 128
_ROW_ALIGN = 16          # sublane-safe row alignment for both f32 (8) and bf16 (16)
_MAX_RESIDENT_K = 4096   # above this, tile the first matmul's reduction dim
_DEFAULT_TK = 1024


def _round_up(v, m):
    return ((v + m - 1) // m) * m


def _pad_to(a, shape):
    pads = [(0, s - d) for d, s in zip(a.shape, shape)]
    if all(p == (0, 0) for p in pads):
        return a
    return jnp.pad(a, pads)


def _choose_tk(dp_in, max_tk):
    """Largest multiple of 128 that divides dp_in and is <= max_tk."""
    max_tk = max(_LANE, (max_tk // _LANE) * _LANE)
    if dp_in <= max_tk:
        return dp_in
    best = _LANE
    for t in range(_LANE, max_tk + 1, _LANE):
        if dp_in % t == 0:
            best = t
    return best


def _vmem_cap_bytes():
    """~75% of per-core VMEM capacity (generation aware); safe fallback."""
    try:
        return int(pltpu.get_tpu_info().vmem_capacity_bytes) * 3 // 4
    except Exception:
        return 48 << 20


# ----------------------------------------------------------------------------
# Pallas kernel: MLP forward.  Grid = (row_tiles, k_tiles).
#   x_ref  : [TILE_R, TK]   bf16 (streamed)      w1_ref : [TK, Hp]      bf16
#   b1_ref : [1, Hp]        f32                  wh_ref : [L, Hp, Hp]   bf16
#   bh_ref : [L, 1, Hp]     f32                  wo_ref : [Hp, Dp_out]  bf16
#   bo_ref : [1, Dp_out]    f32                  o_ref  : [TILE_R, Dp_out]
#   acc_ref: [TILE_R, Hp]   f32 scratch (first-layer K accumulation)
#   h_ref  : [TILE_R, Hp]   bf16 scratch (ReLU intermediate)
# ----------------------------------------------------------------------------
def _mlp_kernel(*refs, n_inner):
    if n_inner > 0:
        (x_ref, w1_ref, b1_ref, wh_ref, bh_ref, wo_ref, bo_ref,
         o_ref, acc_ref, h_ref) = refs
    else:
        (x_ref, w1_ref, b1_ref, wo_ref, bo_ref,
         o_ref, acc_ref, h_ref) = refs
        wh_ref = bh_ref = None

    k = pl.program_id(1)
    nk = pl.num_programs(1)

    @pl.when(k == 0)
    def _init():
        acc_ref[...] = jnp.zeros_like(acc_ref)

    # First layer: accumulate x @ w1 over the K grid axis in f32.
    acc_ref[...] += jnp.dot(x_ref[...], w1_ref[...],
                            preferred_element_type=jnp.float32)

    @pl.when(k == nk - 1)
    def _finish():
        # Bias + ReLU epilogue in f32, then store the bf16 intermediate.
        h_ref[...] = jnp.maximum(acc_ref[...] + b1_ref[...], 0.0
                                 ).astype(h_ref.dtype)

        def layer(i):
            a = jnp.dot(h_ref[...], wh_ref[i],
                        preferred_element_type=jnp.float32)
            h_ref[...] = jnp.maximum(a + bh_ref[i], 0.0).astype(h_ref.dtype)

        if 0 < n_inner <= 4:
            for i in range(n_inner):          # shallow: static unroll
                layer(i)
        elif n_inner > 4:                      # deep: bound live ranges
            def body(i, carry):
                layer(i)
                return carry
            lax.fori_loop(0, n_inner, body, 0, unroll=False)

        a = jnp.dot(h_ref[...], wo_ref[...],
                    preferred_element_type=jnp.float32)
        o_ref[...] = (a + bo_ref[...]).astype(o_ref.dtype)


# ----------------------------------------------------------------------------
# Wrapper: pad to TPU-friendly layout, tile rows (and K if large), call kernel.
# ----------------------------------------------------------------------------
@functools.partial(jax.jit, static_argnames=("n_inner", "out_dim", "row_tile",
                                             "k_block", "out_dtype"))
def mlp_forward(x2d, kernel_params, n_inner, out_dim, row_tile=512,
                k_block=None, out_dtype=jnp.float32):
    w1p, b1p, whp, bhp, wop, bop = kernel_params
    rows = x2d.shape[0]
    dp_in, hp = w1p.shape
    dp_out = wop.shape[1]
    compute_dtype = w1p.dtype
    w_item = jnp.dtype(compute_dtype).itemsize
    out_item = jnp.dtype(out_dtype).itemsize
    L = whp.shape[0] if n_inner > 0 else 0

    # --- K tiling of the first matmul (full_mlp with large num_inds*dim_in) --
    if k_block is None:
        tk = dp_in if dp_in <= _MAX_RESIDENT_K else _choose_tk(dp_in, _DEFAULT_TK)
    else:
        tk = _choose_tk(dp_in, k_block)
    n_k = dp_in // tk

    # --- Row tiling: derive tile from the row count; >=2 tiles when possible
    #     so v7x's second TensorCore gets work ("parallel" axis). -------------
    n_tiles = pl.cdiv(rows, row_tile)
    if n_tiles < 2 and rows >= 2 * _ROW_ALIGN:
        n_tiles = 2
    tile_r = _round_up(pl.cdiv(rows, n_tiles), _ROW_ALIGN)

    # --- VMEM budget (generation-aware), shrink tile_r if needed. -----------
    cap = _vmem_cap_bytes()
    fixed_bytes = ((1 if n_k == 1 else 2) * tk * hp * w_item   # w1 buffers
                   + hp * 4 + dp_out * 4                       # b1, bo (f32)
                   + L * hp * hp * w_item + L * hp * 4         # wh, bh
                   + hp * dp_out * w_item)                     # wo

    def _dyn_bytes(tr):
        return (2 * tr * tk * w_item            # x (bf16, double-buffered)
                + 2 * tr * dp_out * out_item    # output (double-buffered)
                + tr * hp * (4 + w_item))       # f32 acc + bf16 h scratch

    slack = 4 << 20
    while tile_r > _ROW_ALIGN and fixed_bytes + _dyn_bytes(tile_r) + slack > cap:
        tile_r = max(_ROW_ALIGN, _round_up(tile_r // 2, _ROW_ALIGN))
    vmem_limit = int(min(cap, max(16 << 20,
                                  fixed_bytes + _dyn_bytes(tile_r) + slack)))

    n_tiles = pl.cdiv(rows, tile_r)
    rows_p = n_tiles * tile_r

    # Stream x in the compute dtype (halves the per-tile DMA vs. f32).
    xp = _pad_to(x2d.astype(compute_dtype), (rows_p, dp_in))

    # Advisory cost estimate.
    flops = 2 * rows_p * (dp_in * hp + n_inner * hp * hp + hp * dp_out)
    bytes_accessed = int(rows_p * dp_in * w_item + rows_p * dp_out * out_item
                         + fixed_bytes)
    cost = pl.CostEstimate(flops=int(flops), transcendentals=0,
                           bytes_accessed=bytes_accessed)

    def _resident(shape, rank):
        # Constant block index -> never re-fetched; single-buffer to save VMEM.
        return pl.BlockSpec(shape, lambda r, k: (0,) * rank,
                            pipeline_mode=pl.Buffered(1))

    if n_k == 1:
        w1_spec = _resident((tk, hp), 2)
    else:
        w1_spec = pl.BlockSpec((tk, hp), lambda r, k: (k, 0))

    in_specs = [
        pl.BlockSpec((tile_r, tk), lambda r, k: (r, k)),   # x: row/K tiled
        w1_spec,
        _resident((1, hp), 2),                             # b1
    ]
    args = [xp, w1p, b1p]
    if n_inner > 0:
        in_specs += [_resident(whp.shape, 3), _resident(bhp.shape, 3)]
        args += [whp, bhp]
    in_specs += [_resident((hp, dp_out), 2), _resident((1, dp_out), 2)]
    args += [wop, bop]

    out = pl.pallas_call(
        functools.partial(_mlp_kernel, n_inner=n_inner),
        out_shape=jax.ShapeDtypeStruct((rows_p, dp_out), out_dtype),
        grid=(n_tiles, n_k),
        in_specs=in_specs,
        out_specs=pl.BlockSpec((tile_r, dp_out), lambda r, k: (r, 0)),
        scratch_shapes=[pltpu.VMEM((tile_r, hp), jnp.float32),
                        pltpu.VMEM((tile_r, hp), compute_dtype)],
        compiler_params=pltpu.CompilerParams(
            dimension_semantics=("parallel", "arbitrary"),
            vmem_limit_bytes=vmem_limit),
        cost_estimate=cost,
    )(*args)

    return out[:rows, :out_dim]


# ----------------------------------------------------------------------------
# Parameter construction (logical, f32) and kernel-layout preparation.
# ----------------------------------------------------------------------------
def make_mlp_params(key, d_in, d_hidden, d_out, n_hidden, dtype=jnp.float32):
    n_inner = max(n_hidden - 1, 0)
    k1, k2, k3, k4, k5, k6 = jax.random.split(key, 6)
    scale = 0.1
    w1 = scale * jax.random.normal(k1, (d_in, d_hidden), dtype)
    b1 = scale * jax.random.normal(k2, (1, d_hidden), dtype)
    if n_inner > 0:
        wh = scale * jax.random.normal(k3, (n_inner, d_hidden, d_hidden), dtype)
        bh = scale * jax.random.normal(k4, (n_inner, 1, d_hidden), dtype)
    else:
        wh = jnp.zeros((0, d_hidden, d_hidden), dtype)
        bh = jnp.zeros((0, 1, d_hidden), dtype)
    wo = scale * jax.random.normal(k5, (d_hidden, d_out), dtype)
    bo = scale * jax.random.normal(k6, (1, d_out), dtype)
    return (w1, b1, wh, bh, wo, bo)


def prepare_kernel_params(params, compute_dtype=jnp.bfloat16):
    """Pad feature dims to 128-lane multiples; weights -> bf16, biases -> f32."""
    w1, b1, wh, bh, wo, bo = params
    d_in, d_h = w1.shape
    d_out = wo.shape[1]
    dp_in, hp, dp_out = (_round_up(d, _LANE) for d in (d_in, d_h, d_out))
    n_inner = wh.shape[0]

    w1p = _pad_to(w1, (dp_in, hp)).astype(compute_dtype)
    b1p = _pad_to(b1, (1, hp)).astype(jnp.float32)
    if n_inner > 0:
        whp = _pad_to(wh, (n_inner, hp, hp)).astype(compute_dtype)
        bhp = _pad_to(bh, (n_inner, 1, hp)).astype(jnp.float32)
    else:
        whp = None      # specialized: not passed to the kernel at all
        bhp = None
    wop = _pad_to(wo, (hp, dp_out)).astype(compute_dtype)
    bop = _pad_to(bo, (1, dp_out)).astype(jnp.float32)
    return (w1p, b1p, whp, bhp, wop, bop), n_inner


# ----------------------------------------------------------------------------
# InducedNetwork forward (glue in plain JAX, hot path in the Pallas kernel).
# ----------------------------------------------------------------------------
def induced_network_forward(x, net_type, kernel_params, n_inner, num_inds,
                            dim_out, out_dtype=jnp.float32, row_tile=512,
                            k_block=None):
    bs, ni, di = x.shape
    assert ni == num_inds
    if net_type == "full_mlp":
        x2d = x.reshape(bs, ni * di)                  # [bs, num_inds*dim_in]
        y = mlp_forward(x2d, kernel_params, n_inner=n_inner,
                        out_dim=num_inds * dim_out, row_tile=row_tile,
                        k_block=k_block, out_dtype=out_dtype)
        return y.reshape(bs, num_inds, dim_out)
    elif net_type == "elem_mlp":
        x2d = x.reshape(bs * ni, di)                  # [bs*num_inds, dim_in]
        y = mlp_forward(x2d, kernel_params, n_inner=n_inner, out_dim=dim_out,
                        row_tile=row_tile, k_block=k_block, out_dtype=out_dtype)
        return y.reshape(bs, num_inds, dim_out)
    else:
        raise NotImplementedError(
            "set_transformer branch not implemented (ResidualAttention undefined)")


# Pure-JAX reference (same bf16-matmul / f32-accumulate numerics as the kernel).
def _mlp_ref(x2d, params, compute_dtype=jnp.bfloat16):
    w1, b1, wh, bh, wo, bo = params

    def dot(a, b):
        return jnp.dot(a.astype(compute_dtype), b.astype(compute_dtype),
                       preferred_element_type=jnp.float32)

    h = jnp.maximum(dot(x2d, w1) + b1, 0.0)
    for i in range(wh.shape[0]):
        h = jnp.maximum(dot(h, wh[i]) + bh[i], 0.0)
    return dot(h, wo) + bo


if __name__ == "__main__":
    # Small shapes consistent with the module's forward: x is [bs, num_inds, dim_in].
    bs, num_inds, dim_in = 2, 8, 4
    dim_hidden, dim_out, n_hidden = 32, 4, 2

    key = jax.random.PRNGKey(0)
    kx, kp_full, kp_elem, kp_one, kx2, kp_kt = jax.random.split(key, 6)
    x = jax.random.normal(kx, (bs, num_inds, dim_in), jnp.float32)

    # 'full_mlp': MLP(num_inds*dim_in, dim_hidden, num_inds*dim_out, n_hidden)
    params_full = make_mlp_params(kp_full, num_inds * dim_in, dim_hidden,
                                  num_inds * dim_out, n_hidden)
    kparams_full, n_inner_full = prepare_kernel_params(params_full)
    y_full = induced_network_forward(x, "full_mlp", kparams_full, n_inner_full,
                                     num_inds, dim_out)
    y_full = jax.block_until_ready(y_full)
    ref_full = _mlp_ref(x.reshape(bs, -1), params_full).reshape(
        bs, num_inds, dim_out)
    assert y_full.shape == (bs, num_inds, dim_out)
    assert jnp.allclose(y_full, ref_full, atol=2e-3, rtol=2e-3)

    # 'elem_mlp': ElementwiseMLP(dim_in, dim_hidden, dim_out, n_hidden)
    params_elem = make_mlp_params(kp_elem, dim_in, dim_hidden, dim_out, n_hidden)
    kparams_elem, n_inner_elem = prepare_kernel_params(params_elem)
    y_elem = induced_network_forward(x, "elem_mlp", kparams_elem, n_inner_elem,
                                     num_inds, dim_out)
    y_elem = jax.block_until_ready(y_elem)
    ref_elem = _mlp_ref(x.reshape(bs * num_inds, dim_in), params_elem).reshape(
        bs, num_inds, dim_out)
    assert y_elem.shape == (bs, num_inds, dim_out)
    assert jnp.allclose(y_elem, ref_elem, atol=2e-3, rtol=2e-3)

    # n_hidden == 1 case (no inner layers): exercises the n_inner==0 specialization.
    params_one = make_mlp_params(kp_one, dim_in, dim_hidden, dim_out, 1)
    kparams_one, n_inner_one = prepare_kernel_params(params_one)
    y_one = induced_network_forward(x, "elem_mlp", kparams_one, n_inner_one,
                                    num_inds, dim_out)
    y_one = jax.block_until_ready(y_one)
    ref_one = _mlp_ref(x.reshape(bs * num_inds, dim_in), params_one).reshape(
        bs, num_inds, dim_out)
    assert jnp.allclose(y_one, ref_one, atol=2e-3, rtol=2e-3)

    # K-tiled first matmul (full_mlp with a wider num_inds*dim_in, k_block forced
    # small so the accumulation grid axis is exercised at small scale).
    num_inds_kt, dim_in_kt = 64, 4               # d_in = 256 -> two K blocks of 128
    x_kt = jax.random.normal(kx2, (bs, num_inds_kt, dim_in_kt), jnp.float32)
    params_kt = make_mlp_params(kp_kt, num_inds_kt * dim_in_kt, dim_hidden,
                                num_inds_kt * dim_out, n_hidden)
    kparams_kt, n_inner_kt = prepare_kernel_params(params_kt)
    y_kt = induced_network_forward(x_kt, "full_mlp", kparams_kt, n_inner_kt,
                                   num_inds_kt, dim_out, k_block=128)
    y_kt = jax.block_until_ready(y_kt)
    ref_kt = _mlp_ref(x_kt.reshape(bs, -1), params_kt).reshape(
        bs, num_inds_kt, dim_out)
    assert y_kt.shape == (bs, num_inds_kt, dim_out)
    assert jnp.allclose(y_kt, ref_kt, atol=2e-3, rtol=2e-3)

    print("KERNEL_OK")
</pallas_src>

<mosaic_0001>
module attributes {stable_mosaic.version = 11 : i64} {
  func.func @_mlp_kernel(%arg0: i32, %arg1: i32, %arg2: memref<16x128xbf16, #tpu.memory_space<vmem>>, %arg3: memref<128x128xbf16, #tpu.memory_space<vmem>>, %arg4: memref<1x128xf32, #tpu.memory_space<vmem>>, %arg5: memref<1x128x128xbf16, #tpu.memory_space<vmem>>, %arg6: memref<1x1x128xf32, #tpu.memory_space<vmem>>, %arg7: memref<128x128xbf16, #tpu.memory_space<vmem>>, %arg8: memref<1x128xf32, #tpu.memory_space<vmem>>, %arg9: memref<16x128xf32, #tpu.memory_space<vmem>>, %arg10: memref<16x128xf32, #tpu.memory_space<vmem>>, %arg11: memref<16x128xbf16, #tpu.memory_space<vmem>>) attributes {dimension_semantics = [#tpu.dimension_semantics<parallel>, #tpu.dimension_semantics<arbitrary>], iteration_bounds = array<i64: 1, 1>, scalar_prefetch = 0 : i64, scratch_operands = 2 : i64, tpu.core_type = #tpu.core_type<tc>, window_params = [{transform_indices = @transform_0, window_bounds = array<i64: 16, 128>}, {pipeline_mode = #tpu.pipeline_mode<synchronous>, transform_indices = @transform_1, window_bounds = array<i64: 128, 128>}, {pipeline_mode = #tpu.pipeline_mode<synchronous>, transform_indices = @transform_2, window_bounds = array<i64: 1, 128>}, {pipeline_mode = #tpu.pipeline_mode<synchronous>, transform_indices = @transform_3, window_bounds = array<i64: 1, 128, 128>}, {pipeline_mode = #tpu.pipeline_mode<synchronous>, transform_indices = @transform_4, window_bounds = array<i64: 1, 1, 128>}, {pipeline_mode = #tpu.pipeline_mode<synchronous>, transform_indices = @transform_5, window_bounds = array<i64: 128, 128>}, {pipeline_mode = #tpu.pipeline_mode<synchronous>, transform_indices = @transform_6, window_bounds = array<i64: 1, 128>}, {transform_indices = @transform_7, window_bounds = array<i64: 16, 128>}]} {
    %c0_i32 = arith.constant 0 : i32
    %0 = arith.cmpi eq, %arg1, %c0_i32 : i32
    %1 = arith.extui %0 : i1 to i32
    %c0_i32_0 = arith.constant 0 : i32
    %2 = arith.cmpi ne, %1, %c0_i32_0 : i32
    scf.if %2 {
      %cst_10 = arith.constant 0.000000e+00 : f32
      %12 = vector.broadcast %cst_10 : f32 to vector<16x128xf32>
      %c0_11 = arith.constant 0 : index
      %c0_12 = arith.constant 0 : index
      %13 = vector.load %arg10[%c0_11, %c0_12] : memref<16x128xf32, #tpu.memory_space<vmem>>, vector<16x128xf32>
      tpu.vector_store %arg10[%c0_11, %c0_12], %12 {strides = array<i32>} : memref<16x128xf32, #tpu.memory_space<vmem>>, vector<16x128xf32>,
    } else {
    }
    %c0 = arith.constant 0 : index
    %c0_1 = arith.constant 0 : index
    %3 = vector.load %arg10[%c0, %c0_1] : memref<16x128xf32, #tpu.memory_space<vmem>>, vector<16x128xf32>
    %c0_2 = arith.constant 0 : index
    %c0_3 = arith.constant 0 : index
    %4 = vector.load %arg2[%c0_2, %c0_3] : memref<16x128xbf16, #tpu.memory_space<vmem>>, vector<16x128xbf16>
    %c0_4 = arith.constant 0 : index
    %c0_5 = arith.constant 0 : index
    %5 = vector.load %arg3[%c0_4, %c0_5] : memref<128x128xbf16, #tpu.memory_space<vmem>>, vector<128x128xbf16>
    %cst = arith.constant dense<0.000000e+00> : vector<16x128xf32>
    %6 = tpu.matmul %4, %5, %cst {dimension_numbers = #tpu.dot_dimension_numbers<[1], [0], [0], [1], [0, 0, 1, 1], [], []>} : vector<16x128xbf16>, vector<128x128xbf16>, vector<16x128xf32> -> vector<16x128xf32>
    %7 = arith.addf %3, %6 : vector<16x128xf32>
    %c0_6 = arith.constant 0 : index
    %c0_7 = arith.constant 0 : index
    %8 = vector.load %arg10[%c0_6, %c0_7] : memref<16x128xf32, #tpu.memory_space<vmem>>, vector<16x128xf32>
    tpu.vector_store %arg10[%c0_6, %c0_7], %7 {strides = array<i32>} : memref<16x128xf32, #tpu.memory_space<vmem>>, vector<16x128xf32>,
    %c0_i32_8 = arith.constant 0 : i32
    %9 = arith.cmpi eq, %arg1, %c0_i32_8 : i32
    %10 = arith.extui %9 : i1 to i32
    %c0_i32_9 = arith.constant 0 : i32
    %11 = arith.cmpi ne, %10, %c0_i32_9 : i32
    scf.if %11 {
      %c0_10 = arith.constant 0 : index
      %c0_11 = arith.constant 0 : index
      %12 = vector.load %arg10[%c0_10, %c0_11] : memref<16x128xf32, #tpu.memory_space<vmem>>, vector<16x128xf32>
      %c0_12 = arith.constant 0 : index
      %c0_13 = arith.constant 0 : index
      %13 = vector.load %arg4[%c0_12, %c0_13] : memref<1x128xf32, #tpu.memory_space<vmem>>, vector<1x128xf32>
      %14 = vector.broadcast %13 : vector<1x128xf32> to vector<16x128xf32>
      %15 = arith.addf %12, %14 : vector<16x128xf32>
      %cst_14 = arith.constant 0.000000e+00 : f32
      %16 = vector.broadcast %cst_14 : f32 to vector<16x128xf32>
      %17 = arith.maximumf %15, %16 : vector<16x128xf32>
      %18 = arith.truncf %17 : vector<16x128xf32> to vector<16x128xbf16>
      %c0_15 = arith.constant 0 : index
      %c0_16 = arith.constant 0 : index
      %19 = vector.load %arg11[%c0_15, %c0_16] : memref<16x128xbf16, #tpu.memory_space<vmem>>, vector<16x128xbf16>
      tpu.vector_store %arg11[%c0_15, %c0_16], %18 {strides = array<i32>} : memref<16x128xbf16, #tpu.memory_space<vmem>>, vector<16x128xbf16>,
      %c0_17 = arith.constant 0 : index
      %c0_18 = arith.constant 0 : index
      %20 = vector.load %arg11[%c0_17, %c0_18] : memref<16x128xbf16, #tpu.memory_space<vmem>>, vector<16x128xbf16>
      %c0_19 = arith.constant 0 : index
      %c0_20 = arith.constant 0 : index
      %c0_21 = arith.constant 0 : index
      %21 = vector.load %arg5[%c0_19, %c0_20, %c0_21] : memref<1x128x128xbf16, #tpu.memory_space<vmem>>, vector<1x128x128xbf16>
      %22 = vector.shape_cast %21 : vector<1x128x128xbf16> to vector<128x128xbf16>
      %cst_22 = arith.constant dense<0.000000e+00> : vector<16x128xf32>
      %23 = tpu.matmul %20, %22, %cst_22 {dimension_numbers = #tpu.dot_dimension_numbers<[1], [0], [0], [1], [0, 0, 1, 1], [], []>} : vector<16x128xbf16>, vector<128x128xbf16>, vector<16x128xf32> -> vector<16x128xf32>
      %c0_23 = arith.constant 0 : index
      %c0_24 = arith.constant 0 : index
      %c0_25 = arith.constant 0 : index
      %24 = vector.load %arg6[%c0_23, %c0_24, %c0_25] : memref<1x1x128xf32, #tpu.memory_space<vmem>>, vector<1x1x128xf32>
      %25 = vector.shape_cast %24 : vector<1x1x128xf32> to vector<1x128xf32>
      %26 = vector.broadcast %25 : vector<1x128xf32> to vector<16x128xf32>
      %27 = arith.addf %23, %26 : vector<16x128xf32>
      %cst_26 = arith.constant 0.000000e+00 : f32
      %28 = vector.broadcast %cst_26 : f32 to vector<16x128xf32>
      %29 = arith.maximumf %27, %28 : vector<16x128xf32>
      %30 = arith.truncf %29 : vector<16x128xf32> to vector<16x128xbf16>
      %c0_27 = arith.constant 0 : index
      %c0_28 = arith.constant 0 : index
      %31 = vector.load %arg11[%c0_27, %c0_28] : memref<16x128xbf16, #tpu.memory_space<vmem>>, vector<16x128xbf16>
      tpu.vector_store %arg11[%c0_27, %c0_28], %30 {strides = array<i32>} : memref<16x128xbf16, #tpu.memory_space<vmem>>, vector<16x128xbf16>,
      %c0_29 = arith.constant 0 : index
      %c0_30 = arith.constant 0 : index
      %32 = vector.load %arg11[%c0_29, %c0_30] : memref<16x128xbf16, #tpu.memory_space<vmem>>, vector<16x128xbf16>
      %c0_31 = arith.constant 0 : index
      %c0_32 = arith.constant 0 : index
      %33 = vector.load %arg7[%c0_31, %c0_32] : memref<128x128xbf16, #tpu.memory_space<vmem>>, vector<128x128xbf16>
      %cst_33 = arith.constant dense<0.000000e+00> : vector<16x128xf32>
      %34 = tpu.matmul %32, %33, %cst_33 {dimension_numbers = #tpu.dot_dimension_numbers<[1], [0], [0], [1], [0, 0, 1, 1], [], []>} : vector<16x128xbf16>, vector<128x128xbf16>, vector<16x128xf32> -> vector<16x128xf32>
      %c0_34 = arith.constant 0 : index
      %c0_35 = arith.constant 0 : index
      %35 = vector.load %arg8[%c0_34, %c0_35] : memref<1x128xf32, #tpu.memory_space<vmem>>, vector<1x128xf32>
      %36 = vector.broadcast %35 : vector<1x128xf32> to vector<16x128xf32>
      %37 = arith.addf %34, %36 : vector<16x128xf32>
      %c0_36 = arith.constant 0 : index
      %c0_37 = arith.constant 0 : index
      %38 = vector.load %arg9[%c0_36, %c0_37] : memref<16x128xf32, #tpu.memory_space<vmem>>, vector<16x128xf32>
      tpu.vector_store %arg9[%c0_36, %c0_37], %37 {strides = array<i32>} : memref<16x128xf32, #tpu.memory_space<vmem>>, vector<16x128xf32>,
    } else {
    }
    return
  }
  func.func @transform_0(%arg0: i32, %arg1: i32) -> (i32, i32) {
    %c0_i32 = arith.constant 0 : i32
    return %arg0, %arg1 : i32, i32
  }
  func.func @transform_1(%arg0: i32, %arg1: i32) -> (i32, i32) {
    %c0_i32 = arith.constant 0 : i32
    %c0_i32_0 = arith.constant 0 : i32
    %c0_i32_1 = arith.constant 0 : i32
    return %c0_i32, %c0_i32_0 : i32, i32
  }
  func.func @transform_2(%arg0: i32, %arg1: i32) -> (i32, i32) {
    %c0_i32 = arith.constant 0 : i32
    %c0_i32_0 = arith.constant 0 : i32
    %c0_i32_1 = arith.constant 0 : i32
    return %c0_i32, %c0_i32_0 : i32, i32
  }
  func.func @transform_3(%arg0: i32, %arg1: i32) -> (i32, i32, i32) {
    %c0_i32 = arith.constant 0 : i32
    %c0_i32_0 = arith.constant 0 : i32
    %c0_i32_1 = arith.constant 0 : i32
    %c0_i32_2 = arith.constant 0 : i32
    return %c0_i32, %c0_i32_0, %c0_i32_1 : i32, i32, i32
  }
  func.func @transform_4(%arg0: i32, %arg1: i32) -> (i32, i32, i32) {
    %c0_i32 = arith.constant 0 : i32
    %c0_i32_0 = arith.constant 0 : i32
    %c0_i32_1 = arith.constant 0 : i32
    %c0_i32_2 = arith.constant 0 : i32
    return %c0_i32, %c0_i32_0, %c0_i32_1 : i32, i32, i32
  }
  func.func @transform_5(%arg0: i32, %arg1: i32) -> (i32, i32) {
    %c0_i32 = arith.constant 0 : i32
    %c0_i32_0 = arith.constant 0 : i32
    %c0_i32_1 = arith.constant 0 : i32
    return %c0_i32, %c0_i32_0 : i32, i32
  }
  func.func @transform_6(%arg0: i32, %arg1: i32) -> (i32, i32) {
    %c0_i32 = arith.constant 0 : i32
    %c0_i32_0 = arith.constant 0 : i32
    %c0_i32_1 = arith.constant 0 : i32
    return %c0_i32, %c0_i32_0 : i32, i32
  }
  func.func @transform_7(%arg0: i32, %arg1: i32) -> (i32, i32) {
    %c0_i32 = arith.constant 0 : i32
    %c0_i32_0 = arith.constant 0 : i32
    return %arg0, %c0_i32 : i32, i32
  }
}

</mosaic_0001>

<bundles_post_ra>
// kernel: mlp_forward.1
= control target key start
LH: loop header
LB: loop body
LE: loop exit
PB: predicated region body
PF: predicated region fallthrough
CT: control target
= control target key end

     0   :  { %12 = vsyncpa [#allocation5], 0  ;;  %s683_s0 = inlined_call_operand.vmem [shape: bf16[16,128], index: 0, kind: input, shape index: {}]   ;;  %s684_s1 = inlined_call_operand.hbm [shape: bf16[128,128], index: 1, kind: input, shape index: {}]   ;;  %s685_s2 = inlined_call_operand.vmem [shape: f32[1,128], index: 2, kind: input, shape index: {}]   ;;  %s686_s3 = inlined_call_operand.hbm [shape: bf16[1,128,128], index: 3, kind: input, shape index: {}]   ;;  %s687_s4 = inlined_call_operand.vmem [shape: f32[1,1,128], index: 4, kind: input, shape index: {}]   ;;  %s688_s5 = inlined_call_operand.hbm [shape: bf16[128,128], index: 5, kind: input, shape index: {}]   ;;  %s689_s6 = inlined_call_operand.vmem [shape: f32[1,128], index: 6, kind: input, shape index: {}]   ;;  %s690_s7 = inlined_call_operand.vmem [shape: f32[16,128], index: 7, kind: output, shape index: {}]  }
   0x1   :  { %13 = vsyncpa [#allocation7], 0  ;;  %s35_s26 = sshll.u32 %s686_s3, 4  ;;  %s611_s27 = smov [#allocation6]   ;;  %s36_s26 = int_to_ptr.hbm [resolvable:$true] %s35_s26 }
   0x2   :  { %s37_s28 = sshll.u32 %s611_s27, 4  ;;  %s20_s8 = sshll.u32 %s684_s1, 4  ;;  %s38_s28 = int_to_ptr.vmem [resolvable:$true] %s37_s28  ;;  %s21_s8 = int_to_ptr.hbm [resolvable:$true] %s20_s8 }
   0x3   :  { %s612_s9 = smov 64   ;;  %s613_s10 = smov 4  }
   0x4   :  { %43 = dma.hbm_to_vmem [thread:$0]  %s36_s26, 1024, %s38_s28, [#allocation7], %s612_s9, %s612_s9, %s613_s10  }
   0x5   :  { %s614_s11 = smov [#allocation4]   ;;  %s50_s15 = sshll.u32 %s688_s5, 4  ;;  %s51_s15 = int_to_ptr.hbm [resolvable:$true] %s50_s15 }
   0x6   :  { %s22_s12 = sshll.u32 %s614_s11, 4  ;;  %s615_s3 = smov [#allocation8]   ;;  %s23_s12 = int_to_ptr.vmem [resolvable:$true] %s22_s12 }
   0x7   :  { %28 = dma.hbm_to_vmem [thread:$0]  %s21_s8, 1024, %s23_s12, [#allocation5], %s612_s9, %s612_s9, %s613_s10  }
   0x8   :  { %s52_s16 = sshll.u32 %s615_s3, 4  ;;  %s53_s16 = int_to_ptr.vmem [resolvable:$true] %s52_s16 }
   0x9   :  { %58 = dma.hbm_to_vmem [thread:$0]  %s51_s15, 1024, %s53_s16, [#allocation7], %s612_s9, %s612_s9, %s613_s10  }
   0xa   :  { %607 = dma.done.wait [#allocation5], 1024  }
   0xb   :  { %608 = vsyncadd [#allocation5], 4294966272 }
   0xc   :  { %609 = dma.done.wait [#allocation7], 2048  }
   0xd   :  { %610 = vsyncadd [#allocation7], 4294965248  ;;  %v498_v0 = vld [vmem:[#allocation4 + $0x38] sm:$0xff]  ;;  %v497_v1 = vld [vmem:[#allocation4 + $0x30] sm:$0xff] }
   0xe   :  { %153 = vmatpush.bf16.msra.mxu0 %v498_v0  ;;  %v507_v2 = vld [vmem:[#allocation6 + $0x38] sm:$0xff]  ;;  %v506_v3 = vld [vmem:[#allocation6 + $0x30] sm:$0xff]  ;;  %v496_v4 = vld [vmem:[#allocation4 + $0x28] sm:$0xff] }
   0xf   :  { %264 = vmatpush.bf16.msra.mxu1 %v507_v2  ;;  %v495_v5 = vld [vmem:[#allocation4 + $0x20] sm:$0xff]  ;;  %v494_v6 = vld [vmem:[#allocation4 + $0x18] sm:$0xff]  ;;  %v493_v7 = vld [vmem:[#allocation4 + $0x10] sm:$0xff] }
  0x10   :  { %v492_v8 = vld [vmem:[#allocation4 + $0x8] sm:$0xff]  ;;  %v491_v9 = vld [vmem:[#allocation4] sm:$0xff]  ;;  %v490_v10 = vld [vmem:[%s683_s0] sm:$0xff] }
  0x11   :  { %v505_v11 = vld [vmem:[#allocation6 + $0x28] sm:$0xff]  ;;  %v504_v12 = vld [vmem:[#allocation6 + $0x20] sm:$0xff]  ;;  %v503_v13 = vld [vmem:[#allocation6 + $0x18] sm:$0xff] }
  0x12   :  { %154 = vmatpush.bf16.msra.mxu0 %v497_v1  ;;  %v502_v14 = vld [vmem:[#allocation6 + $0x10] sm:$0xff]  ;;  %v501_v15 = vld [vmem:[#allocation6 + $0x8] sm:$0xff]  ;;  %v500_v16 = vld [vmem:[#allocation6] sm:$0xff] }
  0x13   :  { %265 = vmatpush.bf16.msra.mxu1 %v506_v3  ;;  %v516_v17 = vld [vmem:[#allocation8 + $0x38] sm:$0xff]  ;;  %v515_v18 = vld [vmem:[#allocation8 + $0x30] sm:$0xff]  ;;  %v514_v28 = vld [vmem:[#allocation8 + $0x28] sm:$0xff] }
  0x14   :  { %360 = vmatpush.bf16.msra.mxu2 %v516_v17  ;;  %v532_v20 = vld [vmem:[%s685_s2] ss:$0 sm:$0xff]  ;;  %v513_v29 = vld [vmem:[#allocation8 + $0x20] sm:$0xff]  ;;  %v511_v31 = vld [vmem:[#allocation8 + $0x10] sm:$0xff] }
  0x15   :  { %v512_v30 = vld [vmem:[#allocation8 + $0x18] sm:$0xff]  ;;  %v510_v32 = vld [vmem:[#allocation8 + $0x8] sm:$0xff]  ;;  %v509_v33 = vld [vmem:[#allocation8] sm:$0xff] }
  0x16   :  { %155 = vmatpush.bf16.msra.mxu0 %v496_v4  ;;  %v533_v35 = vld [vmem:[%s687_s4] ss:$0 sm:$0xff] }
  0x17   :  { %266 = vmatpush.bf16.msra.mxu1 %v505_v11  ;;  %v534_v43 = vld [vmem:[%s689_s6] ss:$0 sm:$0xff] }
  0x18   :  { %361 = vmatpush.bf16.msra.mxu2 %v515_v18 }
  0x1a   :  { %156 = vmatpush.bf16.msra.mxu0 %v495_v5 }
  0x1b   :  { %267 = vmatpush.bf16.msra.mxu1 %v504_v12 }
  0x1c   :  { %362 = vmatpush.bf16.msra.mxu2 %v514_v28 }
  0x1e   :  { %157 = vmatpush.bf16.msra.mxu0 %v494_v6 }
  0x1f   :  { %268 = vmatpush.bf16.msra.mxu1 %v503_v13 }
  0x20   :  { %363 = vmatpush.bf16.msra.mxu2 %v513_v29 }
  0x22   :  { %158 = vmatpush.bf16.msra.mxu0 %v493_v7 }
  0x23   :  { %269 = vmatpush.bf16.msra.mxu1 %v502_v14 }
  0x24   :  { %364 = vmatpush.bf16.msra.mxu2 %v512_v30 }
  0x26   :  { %159 = vmatpush.bf16.msra.mxu0 %v492_v8 }
  0x27   :  { %270 = vmatpush.bf16.msra.mxu1 %v501_v15 }
  0x28   :  { %365 = vmatpush.bf16.msra.mxu2 %v511_v31 }
  0x2a   :  { %160 = vmatpush.bf16.msra.mxu0 %v491_v9 }
  0x2b   :  { %271 = vmatpush.bf16.msra.mxu1 %v500_v16 }
  0x2c   :  { %366 = vmatpush.bf16.msra.mxu2 %v510_v32 }
  0x2d   :  { %161 = vmatmul.bf16.vlgmr.msra.gmra.mxu0 %v490_v10 }
  0x30   :  { %367 = vmatpush.bf16.msra.mxu2 %v509_v33 }
  0xaa   :  { %v162_v19 = vpop.f32.mrf.mxu0 }
  0xab   :  { %v180_v21 = vadd.f32 %v532_v20, %v162_v19 }
  0xad   :  { %v182_v24 = vmax.f32 %v180_v21, 0.0 }
  0xb2   :  { %v164_v22 = vpop.f32.mrf.mxu0 }
  0xb3   :  { %v181_v23 = vadd.f32 %v532_v20, %v164_v22 }
  0xb5   :  { %v183_v25 = vmax.f32 %v181_v23, 0.0 }
  0xb7   :  { %v520_v26 = vpack.c.bf16 %v183_v25, %v182_v24 }
  0xb9   :  { %521 = vst [vmem:[#allocation3] sm:$0xff] %v520_v26  }
  0xc0   :  { %v499_v27 = vld [vmem:[#allocation3] sm:$0xff] }
  0xc1   :  { %272 = vmatmul.bf16.vlgmr.msra.gmra.mxu1 %v499_v27 }
 0x13e   :  { %v273_v34 = vpop.f32.mrf.mxu1 }
 0x13f   :  { %v274_v36 = vadd.f32 %v533_v35, %v273_v34 }
 0x141   :  { %v278_v39 = vmax.f32 %v274_v36, 0.0 }
 0x146   :  { %v275_v37 = vpop.f32.mrf.mxu1 }
 0x147   :  { %v276_v38 = vadd.f32 %v533_v35, %v275_v37 }
 0x149   :  { %v279_v40 = vmax.f32 %v276_v38, 0.0 }
 0x14b   :  { %v525_v41 = vpack.c.bf16 %v279_v40, %v278_v39 }
 0x14d   :  { %526 = vst [vmem:[#allocation3] sm:$0xff] %v525_v41  }
 0x154   :  { %v508_v42 = vld [vmem:[#allocation3] sm:$0xff] }
 0x155   :  { %368 = vmatmul.bf16.vlgmr.msra.gmra.mxu2 %v508_v42 }
 0x1d8   :  { %v369_v44 = vpop.f32.mrf.mxu2 }
 0x1d9   :  { %v370_v45 = vadd.f32 %v534_v43, %v369_v44 }
 0x1db   :  { %374 = vst [vmem:[%s690_s7] sm:$0xff] %v370_v45 }
 0x1e0   :  { %v371_v46 = vpop.f32.mrf.mxu2 }
 0x1e1   :  { %v372_v47 = vadd.f32 %v534_v43, %v371_v46 }
 0x1e3   :  { %375 = vst [vmem:[%s690_s7 + $0x8] sm:$0xff] %v372_v47 }
 0x1e4   :  { %380 = vsyncpa [#allocation5], 1 }
 0x1e5   :  { %381 = vsyncpa [#allocation7], 1 }

</bundles_post_ra>
